<compile_context>
chip_gen: v5e
topology: v5e:2x2
jax: 0.10.0
libtpu: 0.0.40
codegen_flags: <defaults>
</compile_context>

<pallas_src>
import jax
import jax.numpy as jnp
from jax import lax
from jax.experimental import pallas as pl
from jax.experimental.pallas import tpu as pltpu


def _round_up(x, m):
    return (x + m - 1) // m * m


def _mlp_kernel(u_ref, m_ref, w1u_ref, w1m_ref, b1_ref, w2_ref, b2_ref, o_ref):
    # u_ref:  (TB, E)  bf16 user embedding rows for this batch tile
    # m_ref:  (TB, E)  bf16 movie embedding rows for this batch tile
    # w1u_ref:(E, H)   bf16 fc1 weight (transposed), half acting on user embedding
    # w1m_ref:(E, H)   bf16 fc1 weight (transposed), half acting on movie embedding
    # b1_ref: (1, H)   f32
    # w2_ref: (1, H)   f32 fc2 weight row (fc2 has a single output feature)
    # b2_ref: (1, 1)   f32 fc2 bias scalar (SMEM)
    # o_ref:  (1, TB)  f32 lane-dense output tile
    h = jnp.dot(u_ref[...], w1u_ref[...], preferred_element_type=jnp.float32)
    h = h + jnp.dot(m_ref[...], w1m_ref[...], preferred_element_type=jnp.float32)
    h = jnp.maximum(h + b1_ref[...], 0.0)                       # bias + ReLU (f32, VPU)
    # TODO(synk): dropout omitted — eval-mode identity; training parity would need
    # an in-kernel pltpu.prng_seed/prng_random_bits mask + 1/(1-p) scaling.
    # fc2 with a single output column, emitted lane-major: (1,H) x (TB,H)^T -> (1,TB)
    y = lax.dot_general(w2_ref[...], h,
                        dimension_numbers=(((1,), (1,)), ((), ())),
                        preferred_element_type=jnp.float32)
    o_ref[...] = (y + b2_ref[0, 0]).astype(o_ref.dtype)


def recsys_mlp_pallas(u_emb, m_emb, w1u_t, w1m_t, b1, w2_t, b2, *,
                      block_b=1024, core_parallel=False):
    """u_emb, m_emb: (B, E) -> (B, 1) f32 scores."""
    B, E = u_emb.shape
    H = w1u_t.shape[1]
    assert block_b % 128 == 0, "block_b must be a multiple of 128"

    # Streamed operands enter the MXU in the weight dtype (bf16 by default).
    cdt = w1u_t.dtype
    u_emb = u_emb.astype(cdt)
    m_emb = m_emb.astype(cdt)

    # Batch tile: biggest of (block_b, B rounded up to 128 lanes). Inputs are NOT
    # padded; the last (ragged) block reads undefined rows which only pollute
    # their own output lanes (sliced off below). Output is padded to a multiple
    # of 128 lanes so every store is an unmasked vst.
    tb = min(block_b, _round_up(B, 128))
    n_tiles = pl.cdiv(B, tb)
    b_pad = n_tiles * tb

    b1_2d = b1.reshape(1, H).astype(jnp.float32)
    w2_row = w2_t.reshape(1, H).astype(jnp.float32)
    b2_2d = b2.reshape(1, 1).astype(jnp.float32)

    # Explicit VMEM budget (activations double-buffered + resident weights + output),
    # kept under the 48 MiB recommended ceiling for v7x's 64 MiB/TC.
    itemsize = jnp.dtype(cdt).itemsize
    act_bytes = 2 * 2 * tb * E * itemsize              # u + m tiles, 2 buffers each
    wt_bytes = 2 * 2 * E * H * itemsize                # two W1 halves, default 2 buffers
    misc_bytes = 4 * H * 4 + 2 * tb * 4 + (1 << 20)    # b1, w2, output tile, slack
    vmem_limit = int(min(max(2 * (act_bytes + wt_bytes + misc_bytes), 32 << 20), 48 << 20))

    dim_sem = (pltpu.CORE_PARALLEL,) if core_parallel else ("parallel",)

    out = pl.pallas_call(
        _mlp_kernel,
        out_shape=jax.ShapeDtypeStruct((1, b_pad), jnp.float32),
        grid=(n_tiles,),
        in_specs=[
            pl.BlockSpec((tb, E), lambda i: (i, 0)),            # user emb tile
            pl.BlockSpec((tb, E), lambda i: (i, 0)),            # movie emb tile
            pl.BlockSpec((E, H), lambda i: (0, 0)),             # W1 (user half), resident
            pl.BlockSpec((E, H), lambda i: (0, 0)),             # W1 (movie half), resident
            pl.BlockSpec((1, H), lambda i: (0, 0)),             # b1, resident
            pl.BlockSpec((1, H), lambda i: (0, 0)),             # w2 row, resident
            pl.BlockSpec(memory_space=pltpu.MemorySpace.SMEM),  # b2 scalar
        ],
        out_specs=pl.BlockSpec((1, tb), lambda i: (0, i)),      # lane-dense output tile
        compiler_params=pltpu.CompilerParams(
            dimension_semantics=dim_sem,
            vmem_limit_bytes=vmem_limit,
        ),
    )(u_emb, m_emb, w1u_t, w1m_t, b1_2d, w2_row, b2_2d)

    return out.reshape(-1)[:B].reshape(B, 1)


def recommendation_forward(params, users, movies, *, block_b=1024, core_parallel=False):
    # Embedding row gather stays in XLA (cheap glue); tables are stored bf16 so the
    # gather already halves its HBM traffic.
    # TODO(synk): fusing the gather into the kernel (PrefetchScalarGridSpec +
    # pl.ANY tables + manual DMA gather) only pays off once E*dtype >= ~512 B/row.
    u_emb = jnp.take(params["user_embedding"], users, axis=0)    # (B, E) bf16
    m_emb = jnp.take(params["movie_embedding"], movies, axis=0)  # (B, E) bf16
    return recsys_mlp_pallas(
        u_emb, m_emb,
        params["fc1_wu_t"], params["fc1_wm_t"], params["fc1_b"],
        params["fc2_w_t"], params["fc2_b"],
        block_b=block_b, core_parallel=core_parallel,
    )


def init_params(key, num_users, num_items, embedding_size, hidden_dim):
    k = jax.random.split(key, 6)
    # Deterministic synthetic init (shapes match nn.Embedding / nn.Linear).
    user_embedding = jax.random.normal(k[0], (num_users, embedding_size), jnp.float32)
    movie_embedding = jax.random.normal(k[1], (num_items, embedding_size), jnp.float32)
    # nn.Linear(2E, H): weight (H, 2E) -> stored transposed (2E, H), split in two halves.
    fc1_w_t = jax.random.normal(k[2], (2 * embedding_size, hidden_dim), jnp.float32) * 0.05
    fc1_b = jax.random.normal(k[3], (hidden_dim,), jnp.float32) * 0.05
    # nn.Linear(H, 1): weight (1, H) -> stored transposed (H, 1).
    fc2_w_t = jax.random.normal(k[4], (hidden_dim, 1), jnp.float32) * 0.05
    fc2_b = jax.random.normal(k[5], (1,), jnp.float32) * 0.05
    return {
        # Streamed / large params in bf16 (halves HBM traffic on the mem-bound path).
        "user_embedding": user_embedding.astype(jnp.bfloat16),
        "movie_embedding": movie_embedding.astype(jnp.bfloat16),
        "fc1_wu_t": fc1_w_t[:embedding_size].astype(jnp.bfloat16),   # (E, H)
        "fc1_wm_t": fc1_w_t[embedding_size:].astype(jnp.bfloat16),   # (E, H)
        # Epilogue params stay f32.
        "fc1_b": fc1_b,
        "fc2_w_t": fc2_w_t,
        "fc2_b": fc2_b,
    }


def _reference(params, users, movies):
    # Pure-JAX reference with the same bf16 inputs / f32 accumulation as the kernel.
    u_emb = jnp.take(params["user_embedding"], users, axis=0)
    m_emb = jnp.take(params["movie_embedding"], movies, axis=0)
    h = (jnp.dot(u_emb, params["fc1_wu_t"], preferred_element_type=jnp.float32)
         + jnp.dot(m_emb, params["fc1_wm_t"], preferred_element_type=jnp.float32)
         + params["fc1_b"])
    h = jnp.maximum(h, 0.0)
    return h @ params["fc2_w_t"] + params["fc2_b"]


if __name__ == "__main__":
    # Small, module-consistent shapes. batch=200 exercises both the ragged
    # single-tile path (default block_b) and the multi-tile ragged path (block_b=128).
    num_users, num_items = 500, 700
    embedding_size, hidden_dim = 32, 32
    batch = 200

    key = jax.random.PRNGKey(0)
    kp, ku, km = jax.random.split(key, 3)
    params = init_params(kp, num_users, num_items, embedding_size, hidden_dim)

    users = jax.random.randint(ku, (batch,), 0, num_users, dtype=jnp.int32)
    movies = jax.random.randint(km, (batch,), 0, num_items, dtype=jnp.int32)

    ref = _reference(params, users, movies)

    # Default tile (single ragged block of 256 rows, output padded to 256 lanes).
    out_a = jax.block_until_ready(recommendation_forward(params, users, movies))
    # Small tile (2 blocks of 128 rows, ragged last input block).
    out_b = jax.block_until_ready(
        recommendation_forward(params, users, movies, block_b=128))

    for out in (out_a, out_b):
        assert out.shape == (batch, 1)
        assert jnp.allclose(out, ref, atol=2e-3, rtol=2e-3), \
            float(jnp.max(jnp.abs(out - ref)))

    print("KERNEL_OK")
</pallas_src>

<mosaic_0001>
module attributes {stable_mosaic.version = 11 : i64} {
  func.func @_mlp_kernel(%arg0: i32, %arg1: memref<256x32xbf16, #tpu.memory_space<vmem>>, %arg2: memref<256x32xbf16, #tpu.memory_space<vmem>>, %arg3: memref<32x32xbf16, #tpu.memory_space<vmem>>, %arg4: memref<32x32xbf16, #tpu.memory_space<vmem>>, %arg5: memref<1x32xf32, #tpu.memory_space<vmem>>, %arg6: memref<1x32xf32, #tpu.memory_space<vmem>>, %arg7: memref<1x1xf32, #tpu.memory_space<smem>>, %arg8: memref<1x256xf32, #tpu.memory_space<vmem>>) attributes {dimension_semantics = [#tpu.dimension_semantics<parallel>], iteration_bounds = array<i64: 1>, scalar_prefetch = 0 : i64, scratch_operands = 0 : i64, tpu.core_type = #tpu.core_type<tc>, window_params = [{transform_indices = @transform_0, window_bounds = array<i64: 256, 32>}, {transform_indices = @transform_1, window_bounds = array<i64: 256, 32>}, {pipeline_mode = #tpu.pipeline_mode<synchronous>, transform_indices = @transform_2, window_bounds = array<i64: 32, 32>}, {pipeline_mode = #tpu.pipeline_mode<synchronous>, transform_indices = @transform_3, window_bounds = array<i64: 32, 32>}, {pipeline_mode = #tpu.pipeline_mode<synchronous>, transform_indices = @transform_4, window_bounds = array<i64: 1, 32>}, {pipeline_mode = #tpu.pipeline_mode<synchronous>, transform_indices = @transform_5, window_bounds = array<i64: 1, 32>}, {transform_indices = @transform_6, window_bounds = array<i64: 1, 1>}, {transform_indices = @transform_7, window_bounds = array<i64: 1, 256>}]} {
    %c0 = arith.constant 0 : index
    %c0_0 = arith.constant 0 : index
    %0 = vector.load %arg1[%c0, %c0_0] : memref<256x32xbf16, #tpu.memory_space<vmem>>, vector<256x32xbf16>
    %c0_1 = arith.constant 0 : index
    %c0_2 = arith.constant 0 : index
    %1 = vector.load %arg3[%c0_1, %c0_2] : memref<32x32xbf16, #tpu.memory_space<vmem>>, vector<32x32xbf16>
    %cst = arith.constant dense<0.000000e+00> : vector<256x32xf32>
    %2 = tpu.matmul %0, %1, %cst {dimension_numbers = #tpu.dot_dimension_numbers<[1], [0], [0], [1], [0, 0, 1, 1], [], []>} : vector<256x32xbf16>, vector<32x32xbf16>, vector<256x32xf32> -> vector<256x32xf32>
    %c0_3 = arith.constant 0 : index
    %c0_4 = arith.constant 0 : index
    %3 = vector.load %arg2[%c0_3, %c0_4] : memref<256x32xbf16, #tpu.memory_space<vmem>>, vector<256x32xbf16>
    %c0_5 = arith.constant 0 : index
    %c0_6 = arith.constant 0 : index
    %4 = vector.load %arg4[%c0_5, %c0_6] : memref<32x32xbf16, #tpu.memory_space<vmem>>, vector<32x32xbf16>
    %cst_7 = arith.constant dense<0.000000e+00> : vector<256x32xf32>
    %5 = tpu.matmul %3, %4, %cst_7 {dimension_numbers = #tpu.dot_dimension_numbers<[1], [0], [0], [1], [0, 0, 1, 1], [], []>} : vector<256x32xbf16>, vector<32x32xbf16>, vector<256x32xf32> -> vector<256x32xf32>
    %6 = arith.addf %2, %5 : vector<256x32xf32>
    %c0_8 = arith.constant 0 : index
    %c0_9 = arith.constant 0 : index
    %7 = vector.load %arg5[%c0_8, %c0_9] : memref<1x32xf32, #tpu.memory_space<vmem>>, vector<1x32xf32>
    %8 = vector.broadcast %7 : vector<1x32xf32> to vector<256x32xf32>
    %9 = arith.addf %6, %8 : vector<256x32xf32>
    %cst_10 = arith.constant 0.000000e+00 : f32
    %10 = vector.broadcast %cst_10 : f32 to vector<256x32xf32>
    %11 = arith.maximumf %9, %10 : vector<256x32xf32>
    %c0_11 = arith.constant 0 : index
    %c0_12 = arith.constant 0 : index
    %12 = vector.load %arg6[%c0_11, %c0_12] : memref<1x32xf32, #tpu.memory_space<vmem>>, vector<1x32xf32>
    %cst_13 = arith.constant dense<0.000000e+00> : vector<1x256xf32>
    %13 = tpu.matmul %12, %11, %cst_13 {dimension_numbers = #tpu.dot_dimension_numbers<[1], [1], [0], [0], [0, 0, 1, 0], [], []>} : vector<1x32xf32>, vector<256x32xf32>, vector<1x256xf32> -> vector<1x256xf32>
    %c0_14 = arith.constant 0 : index
    %c0_15 = arith.constant 0 : index
    %14 = memref.load %arg7[%c0_14, %c0_15] : memref<1x1xf32, #tpu.memory_space<smem>>
    %15 = vector.broadcast %14 : f32 to vector<1x256xf32>
    %16 = arith.addf %13, %15 : vector<1x256xf32>
    %c0_16 = arith.constant 0 : index
    %c0_17 = arith.constant 0 : index
    %17 = vector.load %arg8[%c0_16, %c0_17] : memref<1x256xf32, #tpu.memory_space<vmem>>, vector<1x256xf32>
    tpu.vector_store %arg8[%c0_16, %c0_17], %16 {strides = array<i32>} : memref<1x256xf32, #tpu.memory_space<vmem>>, vector<1x256xf32>,
    return
  }
  func.func @transform_0(%arg0: i32) -> (i32, i32) {
    %c0_i32 = arith.constant 0 : i32
    %c0_i32_0 = arith.constant 0 : i32
    return %arg0, %c0_i32 : i32, i32
  }
  func.func @transform_1(%arg0: i32) -> (i32, i32) {
    %c0_i32 = arith.constant 0 : i32
    %c0_i32_0 = arith.constant 0 : i32
    return %arg0, %c0_i32 : i32, i32
  }
  func.func @transform_2(%arg0: i32) -> (i32, i32) {
    %c0_i32 = arith.constant 0 : i32
    %c0_i32_0 = arith.constant 0 : i32
    %c0_i32_1 = arith.constant 0 : i32
    return %c0_i32, %c0_i32_0 : i32, i32
  }
  func.func @transform_3(%arg0: i32) -> (i32, i32) {
    %c0_i32 = arith.constant 0 : i32
    %c0_i32_0 = arith.constant 0 : i32
    %c0_i32_1 = arith.constant 0 : i32
    return %c0_i32, %c0_i32_0 : i32, i32
  }
  func.func @transform_4(%arg0: i32) -> (i32, i32) {
    %c0_i32 = arith.constant 0 : i32
    %c0_i32_0 = arith.constant 0 : i32
    %c0_i32_1 = arith.constant 0 : i32
    return %c0_i32, %c0_i32_0 : i32, i32
  }
  func.func @transform_5(%arg0: i32) -> (i32, i32) {
    %c0_i32 = arith.constant 0 : i32
    %c0_i32_0 = arith.constant 0 : i32
    %c0_i32_1 = arith.constant 0 : i32
    return %c0_i32, %c0_i32_0 : i32, i32
  }
  func.func @transform_6(%arg0: i32) -> (i32, i32) {
    %c0_i32 = arith.constant 0 : i32
    %c0_i32_0 = arith.constant 0 : i32
    %c0_i32_1 = arith.constant 0 : i32
    return %c0_i32, %c0_i32_0 : i32, i32
  }
  func.func @transform_7(%arg0: i32) -> (i32, i32) {
    %c0_i32 = arith.constant 0 : i32
    %c0_i32_0 = arith.constant 0 : i32
    return %c0_i32, %arg0 : i32, i32
  }
}

</mosaic_0001>

<bundles_post_ra>
// kernel: tpu_custom_call.1
= control target key start
LH: loop header
LB: loop body
LE: loop exit
PB: predicated region body
PF: predicated region fallthrough
CT: control target
= control target key end

     0   :  { %s1393_s0 = inlined_call_operand.vmem [shape: bf16[200,32], index: 0, kind: input, shape index: {}]   ;;  %s1394_s1 = inlined_call_operand.vmem [shape: bf16[200,32], index: 1, kind: input, shape index: {}]   ;;  %s1395_s2 = inlined_call_operand.vmem [shape: bf16[32,32], index: 2, kind: input, shape index: {}]   ;;  %s1396_s3 = inlined_call_operand.vmem [shape: bf16[32,32], index: 3, kind: input, shape index: {}]   ;;  %s1397_s4 = inlined_call_operand.vmem [shape: f32[1,32], index: 4, kind: input, shape index: {}]   ;;  %s1398_s5 = inlined_call_operand.vmem [shape: f32[1,32], index: 5, kind: input, shape index: {}]   ;;  %s1399_s6 = inlined_call_operand.<no memory space> [shape: f32[1,1], index: 6, kind: input, shape index: {}]   ;;  %s1400_s7 = inlined_call_operand.hbm [shape: f32[1,256], index: 7, kind: output, shape index: {}]  }
   0x1   :  { %v1042_v0 = vld [vmem:[%s1396_s3 + $0x8] sm:$0xff]  ;;  %v1041_v2 = vld [vmem:[%s1396_s3] sm:$0xff] }
   0x2   :  { %v1024_v1 = vld [vmem:[%s1395_s2 + $0x8] sm:$0xff]  ;;  %248 = vmatpush.bf16.msra.mxu0 %v1042_v0  ;;  %v1023_v3 = vld [vmem:[%s1395_s2] sm:$0xff]  ;;  %1043 = vmatpush.bf16.msra.mxu2 %v1042_v0 }
   0x3   :  { %477 = vmatpush.bf16.msra.mxu1 %v1024_v1  ;;  %1045 = vmatpush.bf16.msra.mxu3 %v1024_v1 }
   0x4   :  { %13 = vsyncpa [#allocation4], 0  ;;  %v1025_v4 = vld [vmem:[%s1394_s1] sm:$0xff]  ;;  %vm193_vm0 = vcmask 261120   ;;  %v1016_v6 = vld [vmem:[%s1393_s0 + $0x48] sm:$0xff]  ;;  %s788_s27 = sshll.u32 %s1400_s7, 4  ;;  %s789_s27 = int_to_ptr.hbm [resolvable:$true] %s788_s27 }
   0x5   :  { %v1007_v5 = vld [vmem:[%s1393_s0] sm:$0xff]  ;;  %v1035_v7 = vld [vmem:[%s1394_s1 + $0x50] sm:$0xff]  ;;  %v1026_v8 = vld [vmem:[%s1394_s1 + $0x8] sm:$0xff]  ;;  %vm773_vm1 = vcmask 1040384  }
   0x6   :  { %249 = vmatpush.bf16.msra.mxu0 %v1041_v2  ;;  %1044 = vmatpush.bf16.msra.mxu2 %v1041_v2  ;;  %v1008_v9 = vld [vmem:[%s1393_s0 + $0x8] sm:$0xff]  ;;  %v1017_v10 = vld [vmem:[%s1393_s0 + $0x50] sm:$0xff]  ;;  %v1036_v11 = vld [vmem:[%s1394_s1 + $0x58] sm:$0xff] }
   0x7   :  { %478 = vmatpush.bf16.msra.mxu1 %v1023_v3  ;;  %1046 = vmatpush.bf16.msra.mxu3 %v1023_v3  ;;  %v1027_v12 = vld [vmem:[%s1394_s1 + $0x10] sm:$0xff]  ;;  %v1018_v14 = vld [vmem:[%s1393_s0 + $0x58] sm:$0xff]  ;;  %v1037_v15 = vld [vmem:[%s1394_s1 + $0x60] sm:$0xff] }
   0x8   :  { %v1009_v13 = vld [vmem:[%s1393_s0 + $0x10] sm:$0xff]  ;;  %v1028_v16 = vld [vmem:[%s1394_s1 + $0x18] sm:$0xff]  ;;  %v1019_v18 = vld [vmem:[%s1393_s0 + $0x60] sm:$0xff] }
   0x9   :  { %869 = vmatmul.msk.bf16.vlgmr.msra.gmra.mxu0 %vm193_vm0, %v1025_v4  ;;  %879 = vmatmul.msk.bf16.vlgmr.msra.gmra.mxu2 %vm193_vm0, %v1035_v7  ;;  %v1010_v17 = vld [vmem:[%s1393_s0 + $0x18] sm:$0xff]  ;;  %v1038_v19 = vld [vmem:[%s1394_s1 + $0x68] sm:$0xff]  ;;  %v1029_v20 = vld [vmem:[%s1394_s1 + $0x20] sm:$0xff] }
   0xa   :  { %957 = vmatmul.msk.bf16.vlgmr.msra.gmra.mxu1 %vm193_vm0, %v1007_v5  ;;  %966 = vmatmul.msk.bf16.vlgmr.msra.gmra.mxu3 %vm193_vm0, %v1016_v6  ;;  %v1011_v21 = vld [vmem:[%s1393_s0 + $0x20] sm:$0xff]  ;;  %v1020_v22 = vld [vmem:[%s1393_s0 + $0x68] sm:$0xff]  ;;  %v1039_v23 = vld [vmem:[%s1394_s1 + $0x70] sm:$0xff] }
   0xb   :  { %v1030_v24 = vld [vmem:[%s1394_s1 + $0x28] sm:$0xff]  ;;  %v1021_v26 = vld [vmem:[%s1393_s0 + $0x70] sm:$0xff]  ;;  %v1040_v27 = vld [vmem:[%s1394_s1 + $0x78] sm:$0xff] }
   0xc   :  { %v1012_v25 = vld [vmem:[%s1393_s0 + $0x28] sm:$0xff]  ;;  %v1031_v28 = vld [vmem:[%s1394_s1 + $0x30] sm:$0xff]  ;;  %v1022_v30 = vld [vmem:[%s1393_s0 + $0x78] sm:$0xff] }
   0xd   :  { %v1013_v29 = vld [vmem:[%s1393_s0 + $0x30] sm:$0xff]  ;;  %v1032_v31 = vld [vmem:[%s1394_s1 + $0x38] sm:$0xff]  ;;  %v1033_v33 = vld [vmem:[%s1394_s1 + $0x40] sm:$0xff] }
   0xe   :  { %v1014_v32 = vld [vmem:[%s1393_s0 + $0x38] sm:$0xff]  ;;  %v1015_v34 = vld [vmem:[%s1393_s0 + $0x40] sm:$0xff]  ;;  %v1034_v44 = vld [vmem:[%s1394_s1 + $0x48] sm:$0xff] }
  0x19   :  { %870 = vmatmul.msk.bf16.gmra.mxu0 %vm193_vm0, %v1026_v8  ;;  %880 = vmatmul.msk.bf16.gmra.mxu2 %vm193_vm0, %v1036_v11 }
  0x1a   :  { %958 = vmatmul.msk.bf16.gmra.mxu1 %vm193_vm0, %v1008_v9  ;;  %967 = vmatmul.msk.bf16.gmra.mxu3 %vm193_vm0, %v1017_v10 }
  0x29   :  { %871 = vmatmul.msk.bf16.gmra.mxu0 %vm193_vm0, %v1027_v12  ;;  %881 = vmatmul.msk.bf16.gmra.mxu2 %vm193_vm0, %v1037_v15 }
  0x2a   :  { %959 = vmatmul.msk.bf16.gmra.mxu1 %vm193_vm0, %v1009_v13  ;;  %968 = vmatmul.msk.bf16.gmra.mxu3 %vm193_vm0, %v1018_v14 }
  0x39   :  { %872 = vmatmul.msk.bf16.gmra.mxu0 %vm193_vm0, %v1028_v16  ;;  %882 = vmatmul.msk.bf16.gmra.mxu2 %vm193_vm0, %v1038_v19 }
  0x3a   :  { %960 = vmatmul.msk.bf16.gmra.mxu1 %vm193_vm0, %v1010_v17  ;;  %969 = vmatmul.msk.bf16.gmra.mxu3 %vm193_vm0, %v1019_v18 }
  0x49   :  { %873 = vmatmul.msk.bf16.gmra.mxu0 %vm193_vm0, %v1029_v20  ;;  %883 = vmatmul.msk.bf16.gmra.mxu2 %vm193_vm0, %v1039_v23 }
  0x4a   :  { %961 = vmatmul.msk.bf16.gmra.mxu1 %vm193_vm0, %v1011_v21  ;;  %970 = vmatmul.msk.bf16.gmra.mxu3 %vm193_vm0, %v1020_v22 }
  0x59   :  { %874 = vmatmul.msk.bf16.gmra.mxu0 %vm193_vm0, %v1030_v24  ;;  %884 = vmatmul.msk.bf16.gmra.mxu2 %vm193_vm0, %v1040_v27 }
  0x5a   :  { %962 = vmatmul.msk.bf16.gmra.mxu1 %vm193_vm0, %v1012_v25  ;;  %971 = vmatmul.msk.bf16.gmra.mxu3 %vm193_vm0, %v1021_v26 }
  0x69   :  { %875 = vmatmul.msk.bf16.gmra.mxu0 %vm193_vm0, %v1031_v28 }
  0x6a   :  { %963 = vmatmul.msk.bf16.gmra.mxu1 %vm193_vm0, %v1013_v29  ;;  %972 = vmatmul.msk.bf16.gmra.mxu3 %vm193_vm0, %v1022_v30 }
  0x79   :  { %876 = vmatmul.msk.bf16.gmra.mxu0 %vm193_vm0, %v1032_v31 }
  0x7a   :  { %964 = vmatmul.msk.bf16.gmra.mxu1 %vm193_vm0, %v1014_v32 }
  0x86   :  { %v251_v35 = vpop.f32.mrf.mxu0 }
  0x87   :  { %v480_v36 = vpop.f32.mrf.mxu1 }
  0x88   :  { %v1250_v37 = vadd.f32 %v480_v36, %v251_v35 }
  0x89   :  { %877 = vmatmul.msk.bf16.gmra.mxu0 %vm193_vm0, %v1033_v33 }
  0x8a   :  { %965 = vmatmul.msk.bf16.gmra.mxu1 %vm193_vm0, %v1015_v34 }
  0x8c   :  { %v301_v39 = vpop.f32.mrf.mxu2 }
  0x8d   :  { %v1254_v38 = vpop.f32.mrf.mxu3 }
  0x8e   :  { %v253_v40 = vpop.f32.mrf.mxu0 }
  0x8f   :  { %v482_v41 = vpop.f32.mrf.mxu1 }
  0x90   :  { %v1256_v42 = vadd.f32 %v482_v41, %v253_v40 }
  0x94   :  { %v303_v45 = vpop.f32.mrf.mxu2 }
  0x95   :  { %v1258_v43 = vpop.f32.mrf.mxu3 }
  0x96   :  { %v256_v46 = vpop.f32.mrf.mxu0 }
  0x97   :  { %v485_v47 = vpop.f32.mrf.mxu1 }
  0x98   :  { %v1263_v48 = vadd.f32 %v485_v47, %v256_v46  ;;  %v1295_v46 = vld [vmem:[%s1397_s4] ss:$0 sm:$0xff] }
  0x99   :  { %878 = vmatmul.msk.bf16.gmra.mxu0 %vm193_vm0, %v1034_v44 }
  0x9c   :  { %v306_v50 = vpop.f32.mrf.mxu2 }
  0x9d   :  { %v530_v49 = vpop.f32.mrf.mxu3 }
  0x9e   :  { %v1266_v51 = vadd.f32 %v530_v49, %v301_v39  ;;  %v258_v52 = vpop.f32.mrf.mxu0 }
  0x9f   :  { %v487_v53 = vpop.f32.mrf.mxu1 }
  0xa0   :  { %v1268_v54 = vadd.f32 %v487_v53, %v258_v52 }
  0xa4   :  { %v308_v56 = vpop.f32.mrf.mxu2 }
  0xa5   :  { %v532_v55 = vpop.f32.mrf.mxu3 }
  0xa6   :  { %v1270_v57 = vadd.f32 %v532_v55, %v303_v45  ;;  %v261_v58 = vpop.f32.mrf.mxu0 }
  0xa7   :  { %v490_v59 = vpop.f32.mrf.mxu1 }
  0xa8   :  { %v1272_v60 = vadd.f32 %v490_v59, %v261_v58 }
  0xac   :  { %v311_v62 = vpop.f32.mrf.mxu2 }
  0xad   :  { %v535_v61 = vpop.f32.mrf.mxu3 }
  0xae   :  { %v1274_v63 = vadd.f32 %v535_v61, %v306_v50  ;;  %v263_v0 = vpop.f32.mrf.mxu0 }
  0xaf   :  { %v492_v1 = vpop.f32.mrf.mxu1 }
  0xb0   :  { %v1276_v2 = vadd.f32 %v492_v1, %v263_v0 }
  0xb4   :  { %v313_v8 = vpop.f32.mrf.mxu2 }
  0xb5   :  { %v537_v3 = vpop.f32.mrf.mxu3 }
  0xb6   :  { %v1278_v4 = vadd.f32 %v537_v3, %v308_v56  ;;  %v266_v5 = vpop.f32.mrf.mxu0 }
  0xb7   :  { %v495_v6 = vpop.f32.mrf.mxu1 }
  0xb8   :  { %v1280_v7 = vadd.f32 %v495_v6, %v266_v5 }
  0xbc   :  { %v316_v14 = vpop.f32.mrf.mxu2 }
  0xbd   :  { %v540_v9 = vpop.f32.mrf.mxu3 }
  0xbe   :  { %v1282_v10 = vadd.f32 %v540_v9, %v311_v62  ;;  %v268_v11 = vpop.f32.mrf.mxu0 }
  0xbf   :  { %v497_v12 = vpop.f32.mrf.mxu1 }
  0xc0   :  { %v1284_v13 = vadd.f32 %v497_v12, %v268_v11 }
  0xc4   :  { %v318_v20 = vpop.f32.mrf.mxu2 }
  0xc5   :  { %v542_v15 = vpop.f32.mrf.mxu3 }
  0xc6   :  { %v1286_v16 = vadd.f32 %v542_v15, %v313_v8  ;;  %v271_v17 = vpop.f32.mrf.mxu0 }
  0xc7   :  { %v500_v18 = vpop.f32.mrf.mxu1 }
  0xc8   :  { %v1288_v19 = vadd.f32 %v500_v18, %v271_v17 }
  0xcc   :  { %v321_v25 = vpop.f32.mrf.mxu2 }
  0xcd   :  { %v545_v21 = vpop.f32.mrf.mxu3 }
  0xce   :  { %v273_v22 = vpop.f32.mrf.mxu0  ;;  %v546_v18 = vadd.f32 %v545_v21, %v316_v14  ;;  %v589_v21 = vadd.f32 %v1295_v46, %v1286_v16  ;;  %v587_v16 = vadd.f32 %v1295_v46, %v1278_v4 }
  0xcf   :  { %v502_v23 = vpop.f32.mrf.mxu1 }
  0xd0   :  { %v1290_v24 = vadd.f32 %v502_v23, %v273_v22 }
  0xd4   :  { %v323_v32 = vpop.f32.mrf.mxu2 }
  0xd5   :  { %v547_v26 = vpop.f32.mrf.mxu3 }
  0xd6   :  { %v276_v27 = vpop.f32.mrf.mxu0  ;;  %v548_v8 = vadd.f32 %v547_v26, %v318_v20 }
  0xd7   :  { %v505_v28 = vpop.f32.mrf.mxu1 }
  0xd8   :  { %v591_v22 = vadd.f32 %v1295_v46, %v548_v8 }
  0xdc   :  { %v326_v36 = vpop.f32.mrf.mxu2 }
  0xdd   :  { %v550_v29 = vpop.f32.mrf.mxu3 }
  0xde   :  { %v278_v30 = vpop.f32.mrf.mxu0  ;;  %v551_v59 = vadd.f32 %v550_v29, %v321_v25 }
  0xdf   :  { %v507_v31 = vpop.f32.mrf.mxu1 }
  0xe0   :  { %v592_v9 = vadd.f32 %v1295_v46, %v551_v59 }
  0xe2   :  { %v624_v23 = vmax.f32 %v592_v9, 0.0  ;;  %v568_v9 = vadd.f32 %v1295_v46, %v1272_v60 }
  0xe4   :  { %v328_v44 = vpop.f32.mrf.mxu2 }
  0xe5   :  { %v552_v33 = vpop.f32.mrf.mxu3 }
  0xe6   :  { %v281_v34 = vpop.f32.mrf.mxu0  ;;  %v553_v55 = vadd.f32 %v552_v33, %v323_v32  ;;  %v590_v32 = vadd.f32 %v1295_v46, %v546_v18  ;;  %v623_v33 = vmax.f32 %v591_v22, 0.0  ;;  %v566_v22 = vadd.f32 %v1295_v46, %v1263_v48 }
  0xe7   :  { %v510_v35 = vpop.f32.mrf.mxu1  ;;  %v564_v48 = vadd.f32 %v1295_v46, %v1250_v37 }
  0xe8   :  { %v593_v61 = vadd.f32 %v1295_v46, %v553_v55  ;;  %v511_v29 = vadd.f32 %v510_v35, %v281_v34  ;;  %v622_v34 = vmax.f32 %v590_v32, 0.0 }
  0xe9   :  { %v596_v32 = vmax.f32 %v564_v48, 0.0 }
  0xea   :  { %v625_v11 = vmax.f32 %v593_v61, 0.0 }
  0xed   :  { %v555_v39 = vpop.f32.mrf.mxu3 }
  0xee   :  { %v283_v40 = vpop.f32.mrf.mxu0  ;;  %v556_v47 = vadd.f32 %v555_v39, %v326_v36  ;;  %v508_v36 = vadd.f32 %v507_v31, %v278_v30  ;;  %v576_v39 = vadd.f32 %v1295_v46, %v511_v29  ;;  %v588_v30 = vadd.f32 %v1295_v46, %v1282_v10 }
  0xef   :  { %v512_v41 = vpop.f32.mrf.mxu1  ;;  %v621_v31 = vmax.f32 %v589_v21, 0.0  ;;  %v586_v10 = vadd.f32 %v1295_v46, %v1274_v63  ;;  %v584_v63 = vadd.f32 %v1295_v46, %v1266_v51  ;;  %v598_v29 = vmax.f32 %v566_v22, 0.0 }
  0xf0   :  { %v594_v56 = vadd.f32 %v1295_v46, %v556_v47  ;;  %v513_v12 = vadd.f32 %v512_v41, %v283_v40  ;;  %v506_v40 = vadd.f32 %v505_v28, %v276_v27  ;;  %v575_v41 = vadd.f32 %v1295_v46, %v508_v36 }
  0xf1   :  { %v620_v27 = vmax.f32 %v588_v30, 0.0 }
  0xf2   :  { %v626_v62 = vmax.f32 %v594_v56, 0.0  ;;  %v577_v20 = vadd.f32 %v1295_v46, %v513_v12  ;;  %v607_v47 = vmax.f32 %v575_v41, 0.0  ;;  %v618_v56 = vmax.f32 %v586_v10, 0.0 }
  0xf4   :  { %v609_v14 = vmax.f32 %v577_v20, 0.0  ;;  %v628_v20 = vld [vmem:[%s1398_s5] sm:$0x1]  ;;  %s1075_s5 = smov [#allocation3]  }
  0xf5   :  { %v557_v45 = vpop.f32.mrf.mxu3  ;;  %s786_s24 = sshll.u32 %s1075_s5, 4  ;;  %s787_s24 = int_to_ptr.vmem [resolvable:$true] %s786_s24 }
  0xf6   :  { %v558_v49 = vadd.f32 %v557_v45, %v328_v44  ;;  %v286_v50 = vpop.f32.mrf.mxu0  ;;  %v608_v44 = vmax.f32 %v576_v39, 0.0  ;;  %v574_v45 = vadd.f32 %v1295_v46, %v506_v40  ;;  %v776_v39 = vlaneseq }
  0xf7   :  { %v515_v52 = vpop.f32.mrf.mxu1 }
  0xf8   :  { %v595_v53 = vadd.f32 %v1295_v46, %v558_v49  ;;  %v516_v3 = vadd.f32 %v515_v52, %v286_v50  ;;  %v573_v49 = vadd.f32 %v1295_v46, %v1290_v24  ;;  %v606_v50 = vmax.f32 %v574_v45, 0.0 }
  0xf9   :  { %v619_v52 = vmax.f32 %v587_v16, 0.0  ;;  %v585_v24 = vadd.f32 %v1295_v46, %v1270_v57  ;;  %vm778_vm2 = vcmp.lt.s32.totalorder %v776_v39, 256 }
  0xfa   :  { %v627_v58 = vmax.f32 %v595_v53, 0.0  ;;  %v578_v15 = vadd.f32 %v1295_v46, %v516_v3  ;;  %v572_v53 = vadd.f32 %v1295_v46, %v1288_v19  ;;  %v605_v55 = vmax.f32 %v573_v49, 0.0 }
  0xfb   :  { %v617_v19 = vmax.f32 %v585_v24, 0.0 }
  0xfc   :  { %990 = vmatpush.xpose.msk.msrb.mxu3 %vm193_vm0, %v627_v58  ;;  %v610_v26 = vmax.f32 %v578_v15, 0.0  ;;  %v571_v58 = vadd.f32 %v1295_v46, %v1284_v13  ;;  %v604_v59 = vmax.f32 %v572_v53, 0.0  ;;  %v616_v13 = vmax.f32 %v584_v63, 0.0 }
  0xfd   :  { %v567_v15 = vadd.f32 %v1295_v46, %v1268_v54  ;;  %v565_v54 = vadd.f32 %v1295_v46, %v1256_v42  ;;  %v630_v42 = vstv %s1399_s6 }
  0xfe   :  { %v288_v0 = vpop.f32.mrf.mxu0  ;;  %v603_v57 = vmax.f32 %v571_v58, 0.0 }
  0xff   :  { %v517_v1 = vpop.f32.mrf.mxu1 }
 0x100   :  { %v518_v5 = vadd.f32 %v517_v1, %v288_v0  ;;  %991 = vmatpush.xpose.msk.msrb.mxu3 %vm193_vm0, %v626_v62  ;;  %v570_v0 = vadd.f32 %v1295_v46, %v1280_v7 }
 0x102   :  { %v579_v6 = vadd.f32 %v1295_v46, %v518_v5  ;;  %v569_v5 = vadd.f32 %v1295_v46, %v1276_v2  ;;  %v602_v51 = vmax.f32 %v570_v0, 0.0 }
 0x104   :  { %v611_v17 = vmax.f32 %v579_v6, 0.0  ;;  %992 = vmatpush.xpose.msk.msrb.mxu3 %vm193_vm0, %v625_v11  ;;  %v601_v11 = vmax.f32 %v569_v5, 0.0 }
 0x106   :  { %973 = vmatpush.xpose.msk.msrb.mxu2 %vm193_vm0, %v611_v17  ;;  %v1308_v25 = vpop.f32.mrf.mxu0  ;;  %v600_v17 = vmax.f32 %v568_v9, 0.0 }
 0x107   :  { %v520_v4 = vpop.f32.mrf.mxu1 }
 0x108   :  { %993 = vmatpush.xpose.msk.msrb.mxu3 %vm193_vm0, %v624_v23  ;;  %v521_v2 = vadd.f32 %v520_v4, %v1308_v25  ;;  %v599_v23 = vmax.f32 %v567_v15, 0.0 }
 0x10a   :  { %974 = vmatpush.xpose.msk.msrb.mxu2 %vm193_vm0, %v610_v26  ;;  %v580_v60 = vadd.f32 %v1295_v46, %v521_v2  ;;  %v597_v26 = vmax.f32 %v565_v54, 0.0 }
 0x10c   :  { %994 = vmatpush.xpose.msk.msrb.mxu3 %vm193_vm0, %v623_v33  ;;  %v612_v25 = vmax.f32 %v580_v60, 0.0 }
 0x10e   :  { %975 = vmatpush.xpose.msk.msrb.mxu2 %vm193_vm0, %v609_v14  ;;  %v293_v35 = vpop.f32.mrf.mxu0 }
 0x10f   :  { %v522_v6 = vpop.f32.mrf.mxu1 }
 0x110   :  { %995 = vmatpush.xpose.msk.msrb.mxu3 %vm193_vm0, %v622_v34  ;;  %v523_v8 = vadd.f32 %v522_v6, %v293_v35 }
 0x112   :  { %976 = vmatpush.xpose.msk.msrb.mxu2 %vm193_vm0, %v608_v44  ;;  %v581_v12 = vadd.f32 %v1295_v46, %v523_v8 }
 0x114   :  { %996 = vmatpush.xpose.msk.msrb.mxu3 %vm193_vm0, %v621_v31  ;;  %v613_v18 = vmax.f32 %v581_v12, 0.0 }
 0x116   :  { %977 = vmatpush.xpose.msk.msrb.mxu2 %vm193_vm0, %v607_v47  ;;  %v296_v28 = vpop.f32.mrf.mxu0 }
 0x117   :  { %v526_v1 = vadd.f32 %v1254_v38, %v296_v28 }
 0x118   :  { %997 = vmatpush.xpose.msk.msrb.mxu3 %vm193_vm0, %v620_v27 }
 0x11a   :  { %978 = vmatpush.xpose.msk.msrb.mxu2 %vm193_vm0, %v606_v50 }
 0x11c   :  { %998 = vmatpush.xpose.msk.msrb.mxu3 %vm193_vm0, %v619_v52 }
 0x11e   :  { %979 = vmatpush.xpose.msk.msrb.mxu2 %vm193_vm0, %v605_v55  ;;  %v298_v61 = vpop.f32.mrf.mxu0 }
 0x11f   :  { %v528_v62 = vadd.f32 %v1258_v43, %v298_v61  ;;  %v582_v43 = vadd.f32 %v1295_v46, %v526_v1 }
 0x120   :  { %999 = vmatpush.xpose.msk.msrb.mxu3 %vm193_vm0, %v618_v56 }
 0x121   :  { %v583_v3 = vadd.f32 %v1295_v46, %v528_v62  ;;  %v614_v38 = vmax.f32 %v582_v43, 0.0 }
 0x122   :  { %980 = vmatpush.xpose.msk.msrb.mxu2 %vm193_vm0, %v604_v59 }
 0x123   :  { %v615_v7 = vmax.f32 %v583_v3, 0.0 }
 0x124   :  { %1000 = vmatpush.xpose.msk.msrb.mxu3 %vm193_vm0, %v617_v19 }
 0x126   :  { %981 = vmatpush.xpose.msk.msrb.mxu2 %vm193_vm0, %v603_v57 }
 0x128   :  { %1001 = vmatpush.xpose.msk.msrb.mxu3 %vm193_vm0, %v616_v13 }
 0x12a   :  { %982 = vmatpush.xpose.msk.msrb.mxu2 %vm193_vm0, %v602_v51 }
 0x12c   :  { %1002 = vmatpush.xpose.msk.msrb.mxu3 %vm193_vm0, %v615_v7 }
 0x12e   :  { %983 = vmatpush.xpose.msk.msrb.mxu2 %vm193_vm0, %v601_v11 }
 0x130   :  { %1003 = vmatpush.xpose.msk.msrb.mxu3 %vm193_vm0, %v614_v38 }
 0x132   :  { %984 = vmatpush.xpose.msk.msrb.mxu2 %vm193_vm0, %v600_v17 }
 0x134   :  { %1004 = vmatpush.xpose.msk.msrb.mxu3 %vm193_vm0, %v613_v18 }
 0x136   :  { %985 = vmatpush.xpose.msk.msrb.mxu2 %vm193_vm0, %v599_v23 }
 0x138   :  { %1005 = vmatpush.xpose.msk.msrb.mxu3 %vm193_vm0, %v612_v25 }
 0x13a   :  { %986 = vmatpush.xpose.msk.msrb.mxu2 %vm193_vm0, %v598_v29 }
 0x13b   :  { %1006 = vmatmul.msk.f32.vlgmr.msrb.gmra.mxu3 %vm193_vm0, %v628_v20 }
 0x13e   :  { %987 = vmatpush.xpose.msk.msrb.mxu2 %vm193_vm0, %v597_v26 }
 0x142   :  { %988 = vmatpush.xpose.msk.msrb.mxu2 %vm193_vm0, %v596_v32 }
 0x145   :  { %989 = vmatmul.msk.f32.vlgmr.msrb.gmra.mxu2 %vm193_vm0, %v628_v20 }
 0x1be   :  { %v767_v33 = vpop.f32.mrf.mxu3 }
 0x1bf   :  { %v768_v36 = vadd.f32 %v767_v33, %v630_v42 }
 0x1c1   :  { %v772_v14 = vrot.slane %v768_v36, 7 }
 0x1c8   :  { %v747_v37 = vpop.f32.mrf.mxu2 }
 0x1c9   :  { %v748_v46 = vadd.f32 %v747_v37, %v630_v42 }
 0x1cb   :  { %v774_v21 = vsel %vm773_vm1, %v748_v46, %v772_v14 }
 0x1cc   :  { %780 = vst.msk [vmem:[#allocation3] sm:$0x3] %vm778_vm2, %v774_v21 }
 0x1cd   :  { %791 = dma.vmem_to_hbm [thread:$0]  %s787_s24, 32, %s789_s27, [#allocation4]  }
 0x1ce   :  { %1073 = dma.done.wait [#allocation4], 32  }
 0x1cf   :  { %1074 = vsyncadd [#allocation4], 4294967264 }
 0x1d0   :  { %796 = vsyncpa [#allocation4], 1 }

</bundles_post_ra>
